<compile_context>
chip_gen: v6e
topology: v6e:2x2x1
jax: 0.10.0
libtpu: 0.0.40
codegen_flags: <defaults>
</compile_context>

<pallas_src>
import jax
import jax.numpy as jnp
from jax.experimental import pallas as pl
from jax.experimental.pallas import tpu as pltpu


def _copy_block_kernel(x_ref, o_ref):
    # Fast path: identical (tr, tl) input/output blocks -> pure full-block copy.
    o_ref[...] = x_ref[...]


def _slice_rows_kernel(x_ref, o_ref):
    # Small-L fallback: (tr, L) in, (tr, L_out) out; static in-VMEM slice.
    o_ref[...] = x_ref[:, : o_ref.shape[-1]]


def chomp1d(x: jax.Array, chomp_size: int, *,
            lane_tile_max_bytes: int = 8192,     # contiguous bytes per DMA row
            block_budget_bytes: int = 1 << 20,   # ~1 MiB per block
            row_tile_max: int = 512) -> jax.Array:
    """Pallas implementation of Chomp1d: x[:, :, :-chomp_size].contiguous()."""
    assert chomp_size > 0, "chomp_size must be positive"
    n, c, l = x.shape
    l_out = l - chomp_size
    assert l_out > 0, "chomp_size must be smaller than the sequence length"

    rows = n * c
    itemsize = x.dtype.itemsize
    sub_pack = max(8, 32 // itemsize)            # 8 f32 / 16 bf16 / 32 int8

    # Free reshape: (N, C, L) is row-major contiguous -> (N*C, L) is a view.
    x2 = x.reshape(rows, l)
    out2_shape = jax.ShapeDtypeStruct((rows, l_out), x.dtype)

    if l_out >= 128:
        # ----------------- lane-dense tiled fast path ------------------------
        # Grow the contiguous lane tile first (longer HBM bursts), multiple of
        # 128 lanes and covering ONLY the kept prefix [0, l_out).
        tl_max = max(128, ((lane_tile_max_bytes // itemsize) // 128) * 128)
        tl = min((l_out // 128) * 128, tl_max)

        # Row tile fills the per-block byte budget; rounded to sublane packing
        # (edge block is padded/masked by Pallas), never exceeds full rows.
        tr = min(rows, row_tile_max,
                 max(sub_pack, block_budget_bytes // (tl * itemsize)))
        if tr < rows:
            tr = max(sub_pack, (tr // sub_pack) * sub_pack)

        # v7x megacore: avoid a degenerate 1-step grid so both TCs get work.
        if pl.cdiv(rows, tr) * pl.cdiv(l_out, tl) == 1:
            if l_out >= 256:
                tl = max(128, ((tl // 2) // 128) * 128)
            elif rows >= 2 * sub_pack:
                tr = max(sub_pack, ((tr // 2) // sub_pack) * sub_pack)

        grid = (pl.cdiv(rows, tr), pl.cdiv(l_out, tl))
        block_bytes = tr * tl * itemsize
        vmem_limit = int(min(64 << 20, max(16 << 20, 4 * block_bytes + (2 << 20))))

        out2 = pl.pallas_call(
            _copy_block_kernel,
            out_shape=out2_shape,
            grid_spec=pltpu.PrefetchScalarGridSpec(
                num_scalar_prefetch=0,
                grid=grid,
                in_specs=[pl.BlockSpec((tr, tl), lambda r, li: (r, li))],
                out_specs=pl.BlockSpec((tr, tl), lambda r, li: (r, li)),
            ),
            compiler_params=pltpu.CompilerParams(
                dimension_semantics=("parallel", "parallel"),
                vmem_limit_bytes=vmem_limit,
            ),
        )(x2)
    else:
        # ----------------- small-L fallback (full-width rows) ----------------
        tr = min(rows, row_tile_max,
                 max(sub_pack, block_budget_bytes // max(1, l * itemsize)))
        if tr < rows:
            tr = max(sub_pack, (tr // sub_pack) * sub_pack)
        block_bytes = tr * l * itemsize
        vmem_limit = int(min(64 << 20, max(16 << 20, 4 * block_bytes + (2 << 20))))

        out2 = pl.pallas_call(
            _slice_rows_kernel,
            out_shape=out2_shape,
            grid_spec=pltpu.PrefetchScalarGridSpec(
                num_scalar_prefetch=0,
                grid=(pl.cdiv(rows, tr),),
                in_specs=[pl.BlockSpec((tr, l), lambda r: (r, 0))],
                out_specs=pl.BlockSpec((tr, l_out), lambda r: (r, 0)),
            ),
            compiler_params=pltpu.CompilerParams(
                dimension_semantics=("parallel",),
                vmem_limit_bytes=vmem_limit,
            ),
        )(x2)

    return out2.reshape(n, c, l_out)


if __name__ == "__main__":
    key = jax.random.PRNGKey(0)
    k0, k1, k2, k3 = jax.random.split(key, 4)

    # 1) Small TCN-like feature map (small-L fallback path).
    x = jax.random.normal(k0, (2, 4, 16), dtype=jnp.float32)
    out = jax.block_until_ready(chomp1d(x, 2))
    ref = x[:, :, :-2]
    assert out.shape == ref.shape and out.dtype == x.dtype
    assert jnp.array_equal(out, ref), "mismatch (fallback path)"

    # 2) Mid-size map: tiled path with a masked remainder L tile and
    #    edge-padded input reads into the chomped region.
    x2 = jax.random.normal(k1, (2, 16, 300), dtype=jnp.float32)
    out2 = jax.block_until_ready(chomp1d(x2, 40))
    ref2 = x2[:, :, :-40]
    assert out2.shape == ref2.shape and out2.dtype == x2.dtype
    assert jnp.array_equal(out2, ref2), "mismatch (tiled path, L edge)"

    # 3) Non-multiple-of-8 collapsed rows with a forced small row tile:
    #    exercises row-edge masking AND lane-edge masking simultaneously.
    x3 = jax.random.normal(k2, (3, 7, 200), dtype=jnp.float32)
    out3 = jax.block_until_ready(chomp1d(x3, 5, row_tile_max=8))
    ref3 = x3[:, :, :-5]
    assert out3.shape == ref3.shape and out3.dtype == x3.dtype
    assert jnp.array_equal(out3, ref3), "mismatch (tiled path, row+lane edges)"

    # 4) bf16 dtype preservation on the tiled path.
    x4 = jax.random.normal(k3, (2, 4, 160), dtype=jnp.bfloat16)
    out4 = jax.block_until_ready(chomp1d(x4, 10))
    ref4 = x4[:, :, :-10]
    assert out4.shape == ref4.shape and out4.dtype == x4.dtype
    assert jnp.array_equal(out4, ref4), "mismatch (bf16 tiled path)"

    print("KERNEL_OK")
</pallas_src>

<mosaic_0001>
module attributes {stable_mosaic.version = 11 : i64} {
  func.func @_slice_rows_kernel(%arg0: i32, %arg1: memref<8x16xf32, #tpu.memory_space<vmem>>, %arg2: memref<8x14xf32, #tpu.memory_space<vmem>>) attributes {dimension_semantics = [#tpu.dimension_semantics<parallel>], iteration_bounds = array<i64: 1>, scalar_prefetch = 0 : i64, scratch_operands = 0 : i64, tpu.core_type = #tpu.core_type<tc>, window_params = [{transform_indices = @transform_0, window_bounds = array<i64: 8, 16>}, {transform_indices = @transform_1, window_bounds = array<i64: 8, 14>}]} {
    %c0 = arith.constant 0 : index
    %c0_0 = arith.constant 0 : index
    %0 = vector.load %arg1[%c0, %c0_0] : memref<8x16xf32, #tpu.memory_space<vmem>>, vector<8x14xf32>
    %c0_1 = arith.constant 0 : index
    %c0_2 = arith.constant 0 : index
    %1 = vector.load %arg2[%c0_1, %c0_2] : memref<8x14xf32, #tpu.memory_space<vmem>>, vector<8x14xf32>
    tpu.vector_store %arg2[%c0_1, %c0_2], %0 {strides = array<i32>} : memref<8x14xf32, #tpu.memory_space<vmem>>, vector<8x14xf32>,
    return
  }
  func.func @transform_0(%arg0: i32) -> (i32, i32) {
    %c0_i32 = arith.constant 0 : i32
    %c0_i32_0 = arith.constant 0 : i32
    return %arg0, %c0_i32 : i32, i32
  }
  func.func @transform_1(%arg0: i32) -> (i32, i32) {
    %c0_i32 = arith.constant 0 : i32
    %c0_i32_0 = arith.constant 0 : i32
    return %arg0, %c0_i32 : i32, i32
  }
}

</mosaic_0001>

<bundles_post_ra>
// kernel: tpu_custom_call.1
= control target key start
LH: loop header
LB: loop body
LE: loop exit
PB: predicated region body
PF: predicated region fallthrough
CT: control target
= control target key end

     0   :  { %6 = vsyncpa [#allocation3], 0  ;;  %s103_s0 = inlined_call_operand.hbm [shape: f32[8,16], index: 0, kind: input, shape index: {}]   ;;  %s104_s1 = inlined_call_operand.hbm [shape: f32[8,14], index: 1, kind: output, shape index: {}]  }
   0x1   :  { %7 = vsyncpa [#allocation4], 0  ;;  %s85_s6 = smov [#allocation2]  }
   0x2   :  { %s14_s7 = sshll.u32 %s85_s6, 4  ;;  %s15_s7 = int_to_ptr.vmem [resolvable:$true] %s14_s7 }
   0x3   :  { %s49_s8 = scalar_lea.vmem %s15_s7, 128  ;;  %p54_p1 = scmp.lt.s32.totalorder %s15_s7, %s15_s7 }
   0x4   :  { %p50_p0 = scmp.ne.s32.totalorder %s15_s7, %s49_s8  ;;  %p55_p2 = scmp.lt.s32.totalorder %s49_s8, %s49_s8 }
   0x6   :  { %p56_p3 = por %p55_p2, %p54_p1 }
   0x8   :  { %p57_p4 = pnand %p56_p3, %p50_p0 }
   0xa   :  { %60 = shalt.err (!%p57_p4)
}
   0xb   :  { %17 = dma.hbm_to_vmem [thread:$0]  %s103_s0, 128, %s15_s7, [#allocation3]  }
   0xc   :  { %81 = dma.done.wait [#allocation3], 128  }
   0xd   :  { %82 = vsyncadd [#allocation3], 4294967168  ;;  %s86_s11 = smov [#allocation5]   ;;  %vm22_vm0 = vcmask 113664   ;;  %v21_v0 = vld [vmem:[#allocation2] sm:$0xff] }
   0xe   :  { %s30_s12 = sshll.u32 %s86_s11, 4  ;;  %23 = vst.msk [vmem:[#allocation5] sm:$0xff] %vm22_vm0, %v21_v0  ;;  %s31_s12 = int_to_ptr.vmem [resolvable:$true] %s30_s12 }
   0xf   :  { %s61_s13 = scalar_lea.vmem %s31_s12, 128  ;;  %p66_p6 = scmp.lt.s32.totalorder %s31_s12, %s31_s12 }
  0x10   :  { %p62_p5 = scmp.ne.s32.totalorder %s31_s12, %s61_s13  ;;  %p67_p7 = scmp.lt.s32.totalorder %s61_s13, %s61_s13 }
  0x12   :  { %p68_p8 = por %p67_p7, %p66_p6 }
  0x14   :  { %p69_p9 = pnand %p68_p8, %p62_p5 }
  0x16   :  { %72 = shalt.err (!%p69_p9)
}
  0x17   :  { %33 = dma.vmem_to_hbm [thread:$0]  %s31_s12, 128, %s104_s1, [#allocation4]  }
  0x18   :  { %83 = dma.done.wait [#allocation4], 128  }
  0x19   :  { %84 = vsyncadd [#allocation4], 4294967168 }
  0x1a   :  { %37 = vsyncpa [#allocation3], 1 }
  0x1b   :  { %38 = vsyncpa [#allocation4], 1 }

</bundles_post_ra>
